<compile_context>
chip_gen: v6e
topology: v6e:2x2x1
jax: 0.10.0
libtpu: 0.0.40
codegen_flags: <defaults>
</compile_context>

<pallas_src>
import jax
import jax.numpy as jnp
from jax.experimental import pallas as pl
from jax.experimental.pallas import tpu as pltpu


def _pipeline_kernel(x_ref, w1_ref, b1_ref, w2_ref, b2_ref, o_ref):
    """Runs one row-tile (a whole number of micro-batches) through shard0 then shard1."""
    # --- shard 0: Linear (bf16 MXU, f32 acc) + bias + ReLU (f32 VPU) ---
    h = jnp.dot(x_ref[...], w1_ref[...], preferred_element_type=jnp.float32)
    h = jnp.maximum(h + b1_ref[...], 0.0)

    # --- shard 1: Linear (bf16 MXU, f32 acc) + bias + ReLU (f32 VPU) ---
    y = jnp.dot(h.astype(jnp.bfloat16), w2_ref[...],
                preferred_element_type=jnp.float32)
    y = jnp.maximum(y + b2_ref[...], 0.0)

    o_ref[...] = y.astype(o_ref.dtype)


def _choose_rows_per_step(batch, split_size, target=128):
    """Largest multiple of split_size that divides batch and is <= target (>=split_size)."""
    best = split_size
    rows = split_size
    while rows <= min(batch, target):
        if batch % rows == 0:
            best = rows
        rows += split_size
    return best


def _vmem_limit_bytes(rows, hidden, out_dim):
    bf16, f32 = 2, 4
    tiles = 2 * (rows * hidden * bf16 + rows * out_dim * f32)      # double-buffered in/out
    weights = 2 * (hidden * hidden * bf16 + hidden * out_dim * bf16
                   + hidden * f32 + out_dim * f32)                 # resident params (2 bufs)
    est = tiles + weights
    return int(min(max(2 * est, 8 * 1024 * 1024), 48 * 1024 * 1024))


def distributed_model_forward(xs, params, *, split_size):
    """JAX/Pallas equivalent of DistributedModel.forward.

    xs: [B, H] input, B must be a multiple of split_size.
    params: dict with w1 [H,H], b1 [1,H], w2 [H,O], b2 [1,O] (f32 masters).
    Returns f32 [B, O].
    """
    B, H = xs.shape
    O = params["w2"].shape[1]
    assert B % split_size == 0, "batch must divide evenly into micro-batches"

    # bf16 MXU operands, f32 bias/epilogue.
    x = xs.astype(jnp.bfloat16)
    w1 = params["w1"].astype(jnp.bfloat16)
    w2 = params["w2"].astype(jnp.bfloat16)
    b1 = params["b1"].astype(jnp.float32)
    b2 = params["b2"].astype(jnp.float32)

    # Group micro-batches into MXU-sized row tiles (numerically identical to
    # the split -> pipeline -> cat loop because the shards are per-row maps).
    rows_per_step = _choose_rows_per_step(B, split_size)
    n_steps = B // rows_per_step

    return pl.pallas_call(
        _pipeline_kernel,
        out_shape=jax.ShapeDtypeStruct((B, O), jnp.float32),
        grid=(n_steps,),
        in_specs=[
            # one row tile (k micro-batches) of the input per grid step
            pl.BlockSpec((rows_per_step, H), lambda i: (i, 0)),
            # shard parameters: full arrays, constant index_map -> VMEM-resident
            pl.BlockSpec((H, H), lambda i: (0, 0)),
            pl.BlockSpec((1, H), lambda i: (0, 0)),
            pl.BlockSpec((H, O), lambda i: (0, 0)),
            pl.BlockSpec((1, O), lambda i: (0, 0)),
        ],
        # writing each row tile to its own output slab == torch.cat
        out_specs=pl.BlockSpec((rows_per_step, O), lambda i: (i, 0)),
        compiler_params=pltpu.CompilerParams(
            dimension_semantics=("parallel",),  # micro-batch tiles are independent
            vmem_limit_bytes=_vmem_limit_bytes(rows_per_step, H, O),
        ),
    )(x, w1, b1, w2, b2)


def _reference_forward(xs, params, *, split_size):
    """Pure-JAX reference mirroring the PyTorch pipeline loop with the same
    bf16-operand / f32-accumulation numerics as the kernel."""
    w1 = params["w1"].astype(jnp.bfloat16)
    w2 = params["w2"].astype(jnp.bfloat16)
    b1 = params["b1"].astype(jnp.float32)
    b2 = params["b2"].astype(jnp.float32)
    outs = []
    for start in range(0, xs.shape[0], split_size):
        mb = xs[start:start + split_size].astype(jnp.bfloat16)
        h = jnp.maximum(
            jnp.dot(mb, w1, preferred_element_type=jnp.float32) + b1, 0.0)       # shard 0
        y = jnp.maximum(
            jnp.dot(h.astype(jnp.bfloat16), w2,
                    preferred_element_type=jnp.float32) + b2, 0.0)                # shard 1
        outs.append(y)
    return jnp.concatenate(outs, axis=0)


def _init_params(key, hidden, out_dim):
    k1, k2, k3, k4 = jax.random.split(key, 4)
    scale = 1.0 / jnp.sqrt(hidden)
    return {
        "w1": jax.random.normal(k1, (hidden, hidden), jnp.float32) * scale,
        "b1": jax.random.normal(k2, (1, hidden), jnp.float32) * 0.01,
        "w2": jax.random.normal(k3, (hidden, out_dim), jnp.float32) * scale,
        "b2": jax.random.normal(k4, (1, out_dim), jnp.float32) * 0.01,
    }


if __name__ == "__main__":
    BATCH = 256       # total batch fed to DistributedModel.forward
    SPLIT_SIZE = 64   # micro-batch size (self.split_size); multiple of 16 (bf16 sublane pack)
    HIDDEN = 128      # lane-dense (multiple of 128)
    OUT_DIM = 128     # lane-dense (multiple of 128)

    key = jax.random.PRNGKey(0)
    kx, kp = jax.random.split(key)
    xs = jax.random.normal(kx, (BATCH, HIDDEN), jnp.float32)
    params = _init_params(kp, HIDDEN, OUT_DIM)

    out = distributed_model_forward(xs, params, split_size=SPLIT_SIZE)
    out = jax.block_until_ready(out)

    ref = _reference_forward(xs, params, split_size=SPLIT_SIZE)
    assert out.shape == (BATCH, OUT_DIM)
    assert jnp.allclose(out, ref, atol=1e-4, rtol=1e-4), "mismatch vs reference"

    print("KERNEL_OK")
</pallas_src>

<mosaic_0001>
module attributes {stable_mosaic.version = 11 : i64} {
  func.func @_pipeline_kernel(%arg0: i32, %arg1: memref<128x128xbf16, #tpu.memory_space<vmem>>, %arg2: memref<128x128xbf16, #tpu.memory_space<vmem>>, %arg3: memref<1x128xf32, #tpu.memory_space<vmem>>, %arg4: memref<128x128xbf16, #tpu.memory_space<vmem>>, %arg5: memref<1x128xf32, #tpu.memory_space<vmem>>, %arg6: memref<128x128xf32, #tpu.memory_space<vmem>>) attributes {dimension_semantics = [#tpu.dimension_semantics<parallel>], iteration_bounds = array<i64: 2>, scalar_prefetch = 0 : i64, scratch_operands = 0 : i64, tpu.core_type = #tpu.core_type<tc>, window_params = [{transform_indices = @transform_0, window_bounds = array<i64: 128, 128>}, {pipeline_mode = #tpu.pipeline_mode<synchronous>, transform_indices = @transform_1, window_bounds = array<i64: 128, 128>}, {pipeline_mode = #tpu.pipeline_mode<synchronous>, transform_indices = @transform_2, window_bounds = array<i64: 1, 128>}, {pipeline_mode = #tpu.pipeline_mode<synchronous>, transform_indices = @transform_3, window_bounds = array<i64: 128, 128>}, {pipeline_mode = #tpu.pipeline_mode<synchronous>, transform_indices = @transform_4, window_bounds = array<i64: 1, 128>}, {transform_indices = @transform_5, window_bounds = array<i64: 128, 128>}]} {
    %c0 = arith.constant 0 : index
    %c0_0 = arith.constant 0 : index
    %0 = vector.load %arg1[%c0, %c0_0] : memref<128x128xbf16, #tpu.memory_space<vmem>>, vector<128x128xbf16>
    %c0_1 = arith.constant 0 : index
    %c0_2 = arith.constant 0 : index
    %1 = vector.load %arg2[%c0_1, %c0_2] : memref<128x128xbf16, #tpu.memory_space<vmem>>, vector<128x128xbf16>
    %cst = arith.constant dense<0.000000e+00> : vector<128x128xf32>
    %2 = tpu.matmul %0, %1, %cst {dimension_numbers = #tpu.dot_dimension_numbers<[1], [0], [0], [1], [0, 0, 1, 1], [], []>} : vector<128x128xbf16>, vector<128x128xbf16>, vector<128x128xf32> -> vector<128x128xf32>
    %c0_3 = arith.constant 0 : index
    %c0_4 = arith.constant 0 : index
    %3 = vector.load %arg3[%c0_3, %c0_4] : memref<1x128xf32, #tpu.memory_space<vmem>>, vector<1x128xf32>
    %4 = vector.broadcast %3 : vector<1x128xf32> to vector<128x128xf32>
    %5 = arith.addf %2, %4 : vector<128x128xf32>
    %cst_5 = arith.constant 0.000000e+00 : f32
    %6 = vector.broadcast %cst_5 : f32 to vector<128x128xf32>
    %7 = arith.maximumf %5, %6 : vector<128x128xf32>
    %8 = arith.truncf %7 : vector<128x128xf32> to vector<128x128xbf16>
    %c0_6 = arith.constant 0 : index
    %c0_7 = arith.constant 0 : index
    %9 = vector.load %arg4[%c0_6, %c0_7] : memref<128x128xbf16, #tpu.memory_space<vmem>>, vector<128x128xbf16>
    %cst_8 = arith.constant dense<0.000000e+00> : vector<128x128xf32>
    %10 = tpu.matmul %8, %9, %cst_8 {dimension_numbers = #tpu.dot_dimension_numbers<[1], [0], [0], [1], [0, 0, 1, 1], [], []>} : vector<128x128xbf16>, vector<128x128xbf16>, vector<128x128xf32> -> vector<128x128xf32>
    %c0_9 = arith.constant 0 : index
    %c0_10 = arith.constant 0 : index
    %11 = vector.load %arg5[%c0_9, %c0_10] : memref<1x128xf32, #tpu.memory_space<vmem>>, vector<1x128xf32>
    %12 = vector.broadcast %11 : vector<1x128xf32> to vector<128x128xf32>
    %13 = arith.addf %10, %12 : vector<128x128xf32>
    %cst_11 = arith.constant 0.000000e+00 : f32
    %14 = vector.broadcast %cst_11 : f32 to vector<128x128xf32>
    %15 = arith.maximumf %13, %14 : vector<128x128xf32>
    %c0_12 = arith.constant 0 : index
    %c0_13 = arith.constant 0 : index
    %16 = vector.load %arg6[%c0_12, %c0_13] : memref<128x128xf32, #tpu.memory_space<vmem>>, vector<128x128xf32>
    tpu.vector_store %arg6[%c0_12, %c0_13], %15 {strides = array<i32>} : memref<128x128xf32, #tpu.memory_space<vmem>>, vector<128x128xf32>,
    return
  }
  func.func @transform_0(%arg0: i32) -> (i32, i32) {
    %c0_i32 = arith.constant 0 : i32
    %c0_i32_0 = arith.constant 0 : i32
    return %arg0, %c0_i32 : i32, i32
  }
  func.func @transform_1(%arg0: i32) -> (i32, i32) {
    %c0_i32 = arith.constant 0 : i32
    %c0_i32_0 = arith.constant 0 : i32
    %c0_i32_1 = arith.constant 0 : i32
    return %c0_i32, %c0_i32_0 : i32, i32
  }
  func.func @transform_2(%arg0: i32) -> (i32, i32) {
    %c0_i32 = arith.constant 0 : i32
    %c0_i32_0 = arith.constant 0 : i32
    %c0_i32_1 = arith.constant 0 : i32
    return %c0_i32, %c0_i32_0 : i32, i32
  }
  func.func @transform_3(%arg0: i32) -> (i32, i32) {
    %c0_i32 = arith.constant 0 : i32
    %c0_i32_0 = arith.constant 0 : i32
    %c0_i32_1 = arith.constant 0 : i32
    return %c0_i32, %c0_i32_0 : i32, i32
  }
  func.func @transform_4(%arg0: i32) -> (i32, i32) {
    %c0_i32 = arith.constant 0 : i32
    %c0_i32_0 = arith.constant 0 : i32
    %c0_i32_1 = arith.constant 0 : i32
    return %c0_i32, %c0_i32_0 : i32, i32
  }
  func.func @transform_5(%arg0: i32) -> (i32, i32) {
    %c0_i32 = arith.constant 0 : i32
    %c0_i32_0 = arith.constant 0 : i32
    return %arg0, %c0_i32 : i32, i32
  }
}

</mosaic_0001>

<bundles_post_ra>
// kernel: tpu_custom_call.1
= control target key start
LH: loop header
LB: loop body
LE: loop exit
PB: predicated region body
PF: predicated region fallthrough
CT: control target
= control target key end

     0   :  { %10 = vsyncpa [#allocation3], 0  ;;  %s1513_s0 = inlined_call_operand.hbm [shape: bf16[256,128], index: 0, kind: input, shape index: {}]   ;;  %s1514_s1 = inlined_call_operand.hbm [shape: bf16[128,128], index: 1, kind: input, shape index: {}]   ;;  %s1515_s2 = inlined_call_operand.vmem [shape: f32[1,128], index: 2, kind: input, shape index: {}]   ;;  %s1516_s3 = inlined_call_operand.hbm [shape: bf16[128,128], index: 3, kind: input, shape index: {}]   ;;  %s1517_s4 = inlined_call_operand.vmem [shape: f32[1,128], index: 4, kind: input, shape index: {}]   ;;  %s1518_s5 = inlined_call_operand.hbm [shape: f32[256,128], index: 5, kind: output, shape index: {}]  }
   0x1   :  { %12 = vsyncpa [#allocation3 + $0x1], 0 }
   0x2   :  { %13 = vsyncpa [#allocation6], 0 }
   0x3   :  { %14 = vsyncpa [#allocation4], 0 }
   0x4   :  { %16 = vsyncpa [#allocation4 + $0x1], 0  ;;  %s1262_s18 = smov 0   ;;  %s1264_s19 = smov 0  }
   0x5   :  { %s1266_s20 = smov 0   ;;  %s1268_s21 = smov 0  }
   0x6 LB: > { %s1283_s22 = sadd.s32 4294967295, %s1222_s21   ;;  %s837_s23 = sadd.s32 4294967294, %s1222_s21   ;;  %s1222_s21 = sphi %s1268_s21, %s1541_s21   ;;  %s1218_s20 = sphi %s1266_s20, %s1540_s20   ;;  %s1214_s19 = sphi %s1264_s19, %s1539_s19   ;;  %s1210_s18 = sphi %s1262_s18, %s1538_s18  }
   0x7   : > { %p42_p0 = scmp.ne.s32.totalorder %s1214_s19, %s1210_s18  ;;  %p1519_p1 = scmp.eq.s32.totalorder %s1283_s22, 0 }
   0x8   : > { %p150_p2 = scmp.eq.s32.totalorder %s1283_s22, 1  ;;  %p156_p3 = scmp.eq.s32.totalorder %s837_s23, 1 }
   0x9   : > { %p1292_p4 = por %p1519_p1, %p42_p0  ;;  %p838_p5 = scmp.ge.s32.totalorder %s1222_s21, 1 }
   0xa   : > { %p1297_p6 = por %p156_p3, %p42_p0  ;;  %p163_p7 = scmp.lt.s32.totalorder %s1222_s21, 3 }
   0xb   : > { %s1524_s24 = scalar_select %p1292_p4, 1, 0 }
   0xc   : > { %s1525_s25 = scalar_select %p1297_p6, 1, 0 }
   0xd   : > { %p1302_p8 = pnand %p838_p5, %p163_p7  ;;  %s1224_s27 = smov [#allocation5]  }
   0xe   : > { %s175_s28 = sshll.u32 %s1224_s27, 4  ;;  %s1225_s30 = smov [#allocation7]   ;;  %s176_s28 = int_to_ptr.vmem [resolvable:$true] %s175_s28 }
   0xf   : > { %s1526_s26 = scalar_select %p1302_p8, 1, 0 }
  0x10   : > { %p991_p9 = pneg %p1302_p8  ;;  %s191_s6 = sshll.u32 %s1225_s30, 4  ;;  %s192_s6 = int_to_ptr.vmem [resolvable:$true] %s191_s6 }
  0x11   : > { %s1085_s7 = scalar_lea.vmem %s176_s28, 1024  ;;  %p1093_p5 = scmp.lt.s32.totalorder %s176_s28, %s176_s28 }
  0x12   : > { %p1311_p11 = pnand %p991_p9, %p1519_p1  ;;  %p1086_p13 = scmp.ne.s32.totalorder %s176_s28, %s1085_s7 }
  0x13   : > { %p1094_p7 = scmp.lt.s32.totalorder %s1085_s7, %s1085_s7 }
  0x14   : > { %p1076_p12 = pneg %p1311_p11 }
  0x15   : > { %p1095_p10 = por %p1094_p7, %p1093_p5 }
  0x16   : > { %p1088_p0 = pnand %p1086_p13, %p1076_p12 }
  0x18   : > { %p1089_p3 = pneg %p1088_p0 }
  0x1a   : > { %p1096_p9 = pnand %p1095_p10, %p1089_p3 }
  0x1c   : > { %1099 = shalt.err (!%p1096_p9)
}
  0x1d   : > { %s1520_s8 = smov 64   ;;  %s1227_s9 = smov 4  }
  0x1e   : > { %994 = dma.hbm_to_vmem [thread:$0]  (!%p1311_p11), %s1514_s1, 1024, %s176_s28, [#allocation6], %s1520_s8, %s1520_s8, %s1227_s9  }
  0x1f   : > { %s1111_s12 = scalar_lea.vmem %s192_s6, 1024  ;;  %p1119_p10 = scmp.lt.s32.totalorder %s192_s6, %s192_s6 }
  0x20   : > { %p1112_p13 = scmp.ne.s32.totalorder %s192_s6, %s1111_s12  ;;  %p1120_p3 = scmp.lt.s32.totalorder %s1111_s12, %s1111_s12 }
  0x22   : > { %p1114_p0 = pnand %p1112_p13, %p1076_p12  ;;  %p1121_p7 = por %p1120_p3, %p1119_p10 }
  0x24   : > { %p1115_p5 = pneg %p1114_p0 }
  0x26   : > { %p1122_p9 = pnand %p1121_p7, %p1115_p5 }
  0x28   : > { %1125 = shalt.err (!%p1122_p9)
}
  0x29   : > { %997 = dma.hbm_to_vmem [thread:$0]  (!%p1311_p11), %s1516_s3, 1024, %s192_s6, [#allocation6], %s1520_s8, %s1520_s8, %s1227_s9  }
  0x2a   : > { %s1340_s15 = sadd.s32 1, %s1222_s21   ;;  %s29_s16 = sadd.s32 1, %s1218_s20 }
  0x2b   : > { %s26_s17 = ssub.s32 %s1222_s21, %s1340_s15  ;;  %p36_p12 = scmp.ne.s32.totalorder %s1218_s20, %s1214_s19 }
  0x2c   : > { %p27_p13 = scmp.eq.s32.totalorder %s26_s17, 0  ;;  %p37_p0 = scmp.eq.s32.totalorder %s1222_s21, 0 }
  0x2d   : > { %p1350_p5 = por %p150_p2, %p36_p12  ;;  %p1008_p10 = scmp.lt.s32.totalorder %s1222_s21, 2 }
  0x2e   : > { %s1356_s27 = scalar_select %p27_p13, %s1218_s20, %s29_s16  }
  0x2f   : > { %s1528_s23 = scalar_select %p1350_p5, 1, 0 }
  0x30   : > { %p38_p3 = por %p37_p0, %p36_p12  ;;  %s208_s28 = sand.u32 1, %s1218_s20  }
  0x31   : > { %s842_s29 = sshll.u32 %s208_s28, 6  ;;  %s881_s30 = sshll.u32 %s1222_s21, 10 }
  0x32   : > { %s1363_s10 = scalar_lea.hbm %s1513_s0, %s881_s30  ;;  %s212_s11 = scalar_lea.vmem [#allocation2], %s842_s29 }
  0x33   : > { %s219_s12 = sshll.u32 %s212_s11, 4  ;;  %p1367_p2 = pnand %p1008_p10, %p38_p3  ;;  %s1365_s12 = int_to_ptr.vmem [resolvable:$true] %s219_s12 }
  0x34   : > { %s1371_s14 = scalar_lea.sflag [#allocation3], %s208_s28  ;;  %s1126_s16 = scalar_lea.hbm %s1363_s10, 1024 }
  0x35   : > { %p1127_p11 = scmp.ne.s32.totalorder %s1363_s10, %s1126_s16  ;;  %p1128_p7 = pneg %p1367_p2 }
  0x36   : > { %s1131_s29 = scalar_lea.hbm %s1513_s0, 2048  ;;  %p1132_p13 = scmp.lt.s32.totalorder %s1363_s10, %s1513_s0 }
  0x37   : > { %p1129_p9 = pnand %p1128_p7, %p1127_p11  ;;  %p1133_p0 = scmp.lt.s32.totalorder %s1131_s29, %s1126_s16 }
  0x39   : > { %p1130_p12 = pneg %p1129_p9  ;;  %p1134_p10 = por %p1133_p0, %p1132_p13 }
  0x3b   : > { %p1135_p3 = pnand %p1134_p10, %p1130_p12 }
  0x3d   : > { %1138 = shalt.err (!%p1135_p3)
}
  0x3e   : > { %s1139_s28 = scalar_lea.vmem %s1365_s12, 1024  ;;  %s1228_s11 = smov [#allocation2]  }
  0x3f   : > { %p1140_p1 = scmp.ne.s32.totalorder %s1365_s12, %s1139_s28  ;;  %s1144_s8 = sshll.u32 %s1228_s11, 4  ;;  %s1145_s8 = int_to_ptr.vmem [resolvable:$false] %s1144_s8 }
  0x40   : > { %s1146_s17 = scalar_lea.vmem %s1145_s8, 2048  ;;  %p1147_p9 = scmp.lt.s32.totalorder %s1365_s12, %s1145_s8 }
  0x41   : > { %p1142_p6 = pnand %p1140_p1, %p1128_p7  ;;  %p1148_p5 = scmp.lt.s32.totalorder %s1146_s17, %s1139_s28 }
  0x43   : > { %p1143_p11 = pneg %p1142_p6  ;;  %p1149_p4 = por %p1148_p5, %p1147_p9 }
  0x45   : > { %p1150_p8 = pnand %p1149_p4, %p1143_p11 }
  0x47   : > { %1153 = shalt.err (!%p1150_p8)
}
  0x48   : > { %s1530_s16 = smov 64   ;;  %p1531_p1 = scmp.ne.s32.totalorder %s1526_s26, 0 }
  0x49   : > { %1001 = dma.hbm_to_vmem [thread:$0]  (!%p1367_p2), %s1363_s10, 1024, %s1365_s12, %s1371_s14, %s1530_s16, %s1530_s16, %s1227_s9  }
  0x4a   : > { %231 = sbr.rel (%p1531_p1) target bundleno = 563 (0x233), region = 40  ;;  %s1398_s30 = sand.u32 (!%p1531_p1), 1, %s1214_s19  }
  0x4b   : > { %s846_s8 = sshll.u32 (!%p1531_p1), %s1398_s30, 6  ;;  %s234_s29 = scalar_lea.sflag (!%p1531_p1), [#allocation3], %s1398_s30 }
  0x4c   : > { %s1402_s6 = scalar_lea.vmem (!%p1531_p1), [#allocation2], %s846_s8  ;;  %p1532_p4 = scmp.ne.s32.totalorder (!%p1531_p1), %s1524_s24, 0 }
  0x4f   : > { %1197 = dma.done.wait (%p1532_p4), %s234_s29, 1024  }
  0x50   : > { %1199 = vsyncadd (%p1532_p4), %s234_s29, 4294966272  ;;  %p1533_p6 = scmp.eq.s32.totalorder %s1283_s22, 0 }
  0x52   : > { %1201 = dma.done.wait (%p1533_p6), [#allocation6], 2048   ;;  %p1534_p8 = pmov %p1533_p6 }
  0x53   : > { %v1050_v0 = vld [vmem:[#allocation5 + $0x38] sm:$0xff]   ;;  %v1051_v1 = vld [vmem:[#allocation5 + $0x30] sm:$0xff]   ;;  %v1052_v2 = vld [vmem:[#allocation5 + $0x28] sm:$0xff]   ;;  %s849_s12 = sshll.u32 %s1398_s30, 7  ;;  %s882_s14 = sshll.u32 %s1283_s22, 11 }
  0x54   : > { %1203 = vsyncadd (%p1534_p8), [#allocation6], 4294965248  ;;  %915 = vmatprep.subr.bf16.mxu0 %v1050_v0  ;;  %v1053_v3 = vld [vmem:[#allocation5 + $0x20] sm:$0xff]   ;;  %v1054_v5 = vld [vmem:[#allocation5 + $0x18] sm:$0xff]   ;;  %s1431_s13 = scalar_lea.vmem [#allocation8], %s849_s12  ;;  %s1466_s17 = scalar_lea.hbm %s1518_s5, %s882_s14 }
  0x55   : > { %916 = vmatpush3.bf16.msra.mxu0 %v1050_v0  ;;  %v1058_v4 = vld [vmem:[%s1402_s6] sm:$0xff]   ;;  %v1055_v6 = vld [vmem:[#allocation5 + $0x10] sm:$0xff]   ;;  %v1066_v7 = vld [vmem:[#allocation7 + $0x38] sm:$0xff]   ;;  %s745_s7 = sshll.u32 %s1431_s13, 4  ;;  %s732_s22 = scalar_lea.sflag [#allocation4], %s1398_s30  ;;  %s1468_s7 = int_to_ptr.vmem [resolvable:$true] %s745_s7 }
  0x56   : > { %917 = vmatprep.subr.bf16.mxu0 %v1051_v1  ;;  %931 = vmatprep.mubr.bf16.mxu0 %v1058_v4  ;;  %v1067_v8 = vld [vmem:[#allocation7 + $0x30] sm:$0xff]   ;;  %v1056_v9 = vld [vmem:[#allocation5 + $0x8] sm:$0xff]   ;;  %v1057_v11 = vld [vmem:[#allocation5] sm:$0xff]   ;;  %s1154_s16 = scalar_lea.vmem %s1468_s7, 2048  ;;  %p1535_p2 = scmp.ne.s32.totalorder %s1528_s23, 0 }
  0x57   : > { %947 = vmatprep.subr.bf16.mxu1 %v1066_v7  ;;  %v1068_v10 = vld [vmem:[#allocation7 + $0x28] sm:$0xff]   ;;  %v1069_v12 = vld [vmem:[#allocation7 + $0x20] sm:$0xff]   ;;  %v1070_v13 = vld [vmem:[#allocation7 + $0x18] sm:$0xff]   ;;  %p1155_p5 = scmp.ne.s32.totalorder %s1468_s7, %s1154_s16  ;;  %s1229_s8 = smov [#allocation8]  }
  0x58   : > { %948 = vmatpush3.bf16.msra.mxu1 %v1066_v7  ;;  %v1059_v14 = vld [vmem:[%s1402_s6 + $0x8] sm:$0xff]   ;;  %v1060_v15 = vld [vmem:[%s1402_s6 + $0x10] sm:$0xff]   ;;  %v1061_v16 = vld [vmem:[%s1402_s6 + $0x18] sm:$0xff]   ;;  %s1158_s29 = sshll.u32 %s1229_s8, 4  ;;  %s1159_s29 = int_to_ptr.vmem [resolvable:$false] %s1158_s29 }
  0x59   : > { %918 = vmatpush3.bf16.msra.mxu0 %v1051_v1  ;;  %949 = vmatprep.subr.bf16.mxu1 %v1067_v8  ;;  %v1062_v17 = vld [vmem:[%s1402_s6 + $0x20] sm:$0xff]   ;;  %v1063_v18 = vld [vmem:[%s1402_s6 + $0x28] sm:$0xff]   ;;  %v1064_v19 = vld [vmem:[%s1402_s6 + $0x30] sm:$0xff]   ;;  %p1156_p7 = pnand %p1155_p5, %p1535_p2  ;;  %p1161_p13 = scmp.lt.s32.totalorder %s1468_s7, %s1159_s29 }
  0x5a   : > { %919 = vmatprep.subr.bf16.mxu0 %v1052_v2  ;;  %v1065_v20 = vld [vmem:[%s1402_s6 + $0x38] sm:$0xff]   ;;  %v1071_v21 = vld [vmem:[#allocation7 + $0x10] sm:$0xff]   ;;  %v1072_v22 = vld [vmem:[#allocation7 + $0x8] sm:$0xff]   ;;  %s1160_s6 = scalar_lea.vmem %s1159_s29, 4096 }
  0x5b   : > { %v1073_v23 = vld [vmem:[#allocation7] sm:$0xff]   ;;  %p1157_p12 = pneg %p1156_p7  ;;  %p1162_p0 = scmp.lt.s32.totalorder %s1160_s6, %s1154_s16 }
  0x5c   : > { %950 = vmatpush3.bf16.msra.mxu1 %v1067_v8  ;;  %v850_v26 = vld [vmem:[%s1515_s2] ss:$0 sm:$0xff] }
  0x5d   : > { %920 = vmatpush3.bf16.msra.mxu0 %v1052_v2  ;;  %951 = vmatprep.subr.bf16.mxu1 %v1068_v10  ;;  %p1163_p10 = por %p1162_p0, %p1161_p13 }
  0x5e   : > { %921 = vmatprep.subr.bf16.mxu0 %v1053_v3 }
  0x5f   : > { %p1164_p3 = pnand %p1163_p10, %p1157_p12 }
  0x60   : > { %952 = vmatpush3.bf16.msra.mxu1 %v1068_v10 }
  0x61   : > { %922 = vmatpush3.bf16.msra.mxu0 %v1053_v3  ;;  %953 = vmatprep.subr.bf16.mxu1 %v1069_v12 }
  0x62   : > { %923 = vmatprep.subr.bf16.mxu0 %v1054_v5 }
  0x64   : > { %954 = vmatpush3.bf16.msra.mxu1 %v1069_v12 }
  0x65   : > { %924 = vmatpush3.bf16.msra.mxu0 %v1054_v5  ;;  %955 = vmatprep.subr.bf16.mxu1 %v1070_v13 }
  0x66   : > { %925 = vmatprep.subr.bf16.mxu0 %v1055_v6 }
  0x68   : > { %956 = vmatpush3.bf16.msra.mxu1 %v1070_v13 }
  0x69   : > { %926 = vmatpush3.bf16.msra.mxu0 %v1055_v6  ;;  %957 = vmatprep.subr.bf16.mxu1 %v1071_v21 }
  0x6a   : > { %927 = vmatprep.subr.bf16.mxu0 %v1056_v9 }
  0x6c   : > { %958 = vmatpush3.bf16.msra.mxu1 %v1071_v21 }
  0x6d   : > { %928 = vmatpush3.bf16.msra.mxu0 %v1056_v9  ;;  %959 = vmatprep.subr.bf16.mxu1 %v1072_v22 }
  0x6e   : > { %929 = vmatprep.subr.bf16.mxu0 %v1057_v11 }
  0x70   : > { %960 = vmatpush3.bf16.msra.mxu1 %v1072_v22 }
  0x71   : > { %930 = vmatpush3.bf16.msra.mxu0 %v1057_v11  ;;  %961 = vmatprep.subr.bf16.mxu1 %v1073_v23 }
  0x74   : > { %932 = vmatmul.mubr.bf16.vlgmr.msra.gmra.mxu0 %v1059_v14  ;;  %962 = vmatpush3.bf16.msra.mxu1 %v1073_v23 }
  0x75   : > { %935 = vmatprep.mubr.bf16.mxu0 %v1060_v15 }
  0x7c   : > { %936 = vmatmul.mubr.bf16.gmra.mxu0 %v1061_v16 }
  0x7d   : > { %939 = vmatprep.mubr.bf16.mxu0 %v1062_v17  ;;  %v1426_v17 = vld [vmem:[%s1517_s4] ss:$0 sm:$0xff] }
  0x84   : > { %940 = vmatmul.mubr.bf16.gmra.mxu0 %v1063_v18 }
  0x85   : > { %943 = vmatprep.mubr.bf16.mxu0 %v1064_v19 }
  0x8c   : > { %944 = vmatmul.mubr.bf16.gmra.mxu0 %v1065_v20 }
 0x134   : > { %v933_v24 = vpop.f32.mrf.mxu0 }
 0x135   : > { %v453_v30 = vadd.f32 %v933_v24, %v850_v26 }
 0x136   : > { %v444_v25 = vpop.f32.mrf.mxu0 }
 0x137   : > { %v445_v28 = vadd.f32 %v850_v26, %v444_v25  ;;  %v509_v37 = vmax.f32 %v453_v30, 0.0 }
 0x138   : > { %v934_v27 = vpop.f32.mrf.mxu0 }
 0x139   : > { %v456_v29 = vadd.f32 %v934_v27, %v850_v26  ;;  %v507_v35 = vmax.f32 %v445_v28, 0.0 }
 0x13a   : > { %v447_v31 = vpop.f32.mrf.mxu0 }
 0x13b   : > { %v448_v32 = vadd.f32 %v850_v26, %v447_v31  ;;  %v510_v33 = vmax.f32 %v456_v29, 0.0 }
 0x13c   : > { %v937_v34 = vpop.f32.mrf.mxu0 }
 0x13d   : > { %v508_v36 = vmax.f32 %v448_v32, 0.0  ;;  %v524_v40 = vpack.c.bf16 %v510_v33, %v509_v37  ;;  %v469_v44 = vadd.f32 %v937_v34, %v850_v26 }
 0x13e   : > { %v460_v38 = vpop.f32.mrf.mxu0 }
 0x13f   : > { %v523_v39 = vpack.c.bf16 %v508_v36, %v507_v35  ;;  %v461_v42 = vadd.f32 %v850_v26, %v460_v38  ;;  %v513_v51 = vmax.f32 %v469_v44, 0.0 }
 0x140   : > { %v938_v41 = vpop.f32.mrf.mxu0 }
 0x141   : > { %v472_v43 = vadd.f32 %v938_v41, %v850_v26  ;;  %963 = vmatprep.mubr.bf16.mxu1 %v523_v39  ;;  %v511_v49 = vmax.f32 %v461_v42, 0.0 }
 0x142   : > { %v463_v45 = vpop.f32.mrf.mxu0  ;;  %964 = vmatmul.mubr.bf16.vlgmr.msra.gmra.mxu1 %v524_v40 }
 0x143   : > { %v464_v46 = vadd.f32 %v850_v26, %v463_v45  ;;  %v514_v47 = vmax.f32 %v472_v43, 0.0 }
 0x144   : > { %v941_v48 = vpop.f32.mrf.mxu0 }
 0x145   : > { %v512_v50 = vmax.f32 %v464_v46, 0.0  ;;  %v526_v54 = vpack.c.bf16 %v514_v47, %v513_v51  ;;  %v485_v58 = vadd.f32 %v941_v48, %v850_v26 }
 0x146   : > { %v476_v52 = vpop.f32.mrf.mxu0 }
 0x147   : > { %v525_v53 = vpack.c.bf16 %v512_v50, %v511_v49  ;;  %v477_v56 = vadd.f32 %v850_v26, %v476_v52  ;;  %v517_v1 = vmax.f32 %v485_v58, 0.0 }
 0x148   : > { %v942_v55 = vpop.f32.mrf.mxu0 }
 0x149   : > { %v488_v57 = vadd.f32 %v942_v55, %v850_v26  ;;  %967 = vmatprep.mubr.bf16.mxu1 %v525_v53  ;;  %v515_v63 = vmax.f32 %v477_v56, 0.0 }
 0x14a   : > { %v479_v59 = vpop.f32.mrf.mxu0  ;;  %968 = vmatmul.mubr.bf16.gmra.mxu1 %v526_v54 }
 0x14b   : > { %v480_v60 = vadd.f32 %v850_v26, %v479_v59  ;;  %v518_v61 = vmax.f32 %v488_v57, 0.0 }
 0x14c   : > { %v945_v62 = vpop.f32.mrf.mxu0 }
 0x14d   : > { %v516_v0 = vmax.f32 %v480_v60, 0.0  ;;  %v528_v4 = vpack.c.bf16 %v518_v61, %v517_v1  ;;  %v501_v8 = vadd.f32 %v945_v62, %v850_v26 }
 0x14e   : > { %v492_v2 = vpop.f32.mrf.mxu0 }
 0x14f   : > { %v527_v3 = vpack.c.bf16 %v516_v0, %v515_v63  ;;  %v493_v6 = vadd.f32 %v850_v26, %v492_v2  ;;  %v521_v14 = vmax.f32 %v501_v8, 0.0 }
 0x150   : > { %v946_v5 = vpop.f32.mrf.mxu0 }
 0x151   : > { %v504_v7 = vadd.f32 %v946_v5, %v850_v26  ;;  %971 = vmatprep.mubr.bf16.mxu1 %v527_v3  ;;  %v519_v12 = vmax.f32 %v493_v6, 0.0 }
 0x152   : > { %v495_v9 = vpop.f32.mrf.mxu0  ;;  %972 = vmatmul.mubr.bf16.gmra.mxu1 %v528_v4 }
 0x153   : > { %v496_v10 = vadd.f32 %v850_v26, %v495_v9  ;;  %v522_v11 = vmax.f32 %v504_v7, 0.0 }
 0x155   : > { %v520_v13 = vmax.f32 %v496_v10, 0.0  ;;  %v530_v16 = vpack.c.bf16 %v522_v11, %v521_v14 }
 0x157   : > { %v529_v15 = vpack.c.bf16 %v520_v13, %v519_v12 }
 0x159   : > { %975 = vmatprep.mubr.bf16.mxu1 %v529_v15 }
 0x15a   : > { %976 = vmatmul.mubr.bf16.gmra.mxu1 %v530_v16 }
 0x202   : > { %v965_v18 = vpop.f32.mrf.mxu1 }
 0x203   : > { %v645_v19 = vadd.f32 %v965_v18, %v1426_v17 }
 0x204   : > { %v636_v20 = vpop.f32.mrf.mxu1 }
 0x205   : > { %v701_v21 = vmax.f32 %v645_v19, 0.0  ;;  %v637_v22 = vadd.f32 %v1426_v17, %v636_v20 }
 0x206   : > { %v966_v23 = vpop.f32.mrf.mxu1 }
 0x207   : > { %717 = vst [vmem:[%s1431_s13 + $0x10] sm:$0xff] %v701_v21  ;;  %v699_v24 = vmax.f32 %v637_v22, 0.0  ;;  %v648_v25 = vadd.f32 %v966_v23, %v1426_v17 }
 0x208   : > { %v639_v26 = vpop.f32.mrf.mxu1 }
 0x209   : > { %715 = vst [vmem:[%s1431_s13] sm:$0xff] %v699_v24  ;;  %v702_v27 = vmax.f32 %v648_v25, 0.0  ;;  %v640_v28 = vadd.f32 %v1426_v17, %v639_v26 }
 0x20a   : > { %v969_v29 = vpop.f32.mrf.mxu1 }
 0x20b   : > { %718 = vst [vmem:[%s1431_s13 + $0x18] sm:$0xff] %v702_v27  ;;  %v700_v30 = vmax.f32 %v640_v28, 0.0  ;;  %v661_v31 = vadd.f32 %v969_v29, %v1426_v17 }
 0x20c   : > { %v652_v32 = vpop.f32.mrf.mxu1 }
 0x20d   : > { %716 = vst [vmem:[%s1431_s13 + $0x8] sm:$0xff] %v700_v30  ;;  %v705_v33 = vmax.f32 %v661_v31, 0.0  ;;  %v653_v34 = vadd.f32 %v1426_v17, %v652_v32 }
 0x20e   : > { %v970_v35 = vpop.f32.mrf.mxu1 }
 0x20f   : > { %721 = vst [vmem:[%s1431_s13 + $0x30] sm:$0xff] %v705_v33  ;;  %v703_v36 = vmax.f32 %v653_v34, 0.0  ;;  %v664_v37 = vadd.f32 %v970_v35, %v1426_v17 }
 0x210   : > { %v655_v38 = vpop.f32.mrf.mxu1 }
 0x211   : > { %719 = vst [vmem:[%s1431_s13 + $0x20] sm:$0xff] %v703_v36  ;;  %v706_v39 = vmax.f32 %v664_v37, 0.0  ;;  %v656_v40 = vadd.f32 %v1426_v17, %v655_v38 }
 0x212   : > { %v973_v41 = vpop.f32.mrf.mxu1 }
 0x213   : > { %722 = vst [vmem:[%s1431_s13 + $0x38] sm:$0xff] %v706_v39  ;;  %v704_v42 = vmax.f32 %v656_v40, 0.0  ;;  %v677_v43 = vadd.f32 %v973_v41, %v1426_v17 }
 0x214   : > { %v668_v44 = vpop.f32.mrf.mxu1 }
 0x215   : > { %720 = vst [vmem:[%s1431_s13 + $0x28] sm:$0xff] %v704_v42  ;;  %v709_v45 = vmax.f32 %v677_v43, 0.0  ;;  %v669_v46 = vadd.f32 %v1426_v17, %v668_v44 }
 0x216   : > { %v974_v47 = vpop.f32.mrf.mxu1 }
 0x217   : > { %725 = vst [vmem:[%s1431_s13 + $0x50] sm:$0xff] %v709_v45  ;;  %v707_v48 = vmax.f32 %v669_v46, 0.0  ;;  %v680_v49 = vadd.f32 %v974_v47, %v1426_v17 }
 0x218   : > { %v671_v50 = vpop.f32.mrf.mxu1 }
 0x219   : > { %723 = vst [vmem:[%s1431_s13 + $0x40] sm:$0xff] %v707_v48  ;;  %v710_v51 = vmax.f32 %v680_v49, 0.0  ;;  %v672_v52 = vadd.f32 %v1426_v17, %v671_v50 }
 0x21a   : > { %v977_v53 = vpop.f32.mrf.mxu1 }
 0x21b   : > { %726 = vst [vmem:[%s1431_s13 + $0x58] sm:$0xff] %v710_v51  ;;  %v708_v54 = vmax.f32 %v672_v52, 0.0  ;;  %v693_v55 = vadd.f32 %v977_v53, %v1426_v17 }
 0x21c   : > { %v684_v56 = vpop.f32.mrf.mxu1 }
 0x21d   : > { %724 = vst [vmem:[%s1431_s13 + $0x48] sm:$0xff] %v708_v54  ;;  %v713_v57 = vmax.f32 %v693_v55, 0.0  ;;  %v685_v58 = vadd.f32 %v1426_v17, %v684_v56 }
 0x21e   : > { %v978_v59 = vpop.f32.mrf.mxu1 }
 0x21f   : > { %729 = vst [vmem:[%s1431_s13 + $0x70] sm:$0xff] %v713_v57  ;;  %v711_v60 = vmax.f32 %v685_v58, 0.0  ;;  %v696_v61 = vadd.f32 %v978_v59, %v1426_v17 }
 0x220   : > { %v687_v62 = vpop.f32.mrf.mxu1 }
 0x221   : > { %727 = vst [vmem:[%s1431_s13 + $0x60] sm:$0xff] %v711_v60  ;;  %v714_v63 = vmax.f32 %v696_v61, 0.0  ;;  %v688_v0 = vadd.f32 %v1426_v17, %v687_v62 }
 0x223   : > { %730 = vst [vmem:[%s1431_s13 + $0x78] sm:$0xff] %v714_v63  ;;  %v712_v1 = vmax.f32 %v688_v0, 0.0 }
 0x225   : > { %728 = vst [vmem:[%s1431_s13 + $0x68] sm:$0xff] %v712_v1 }
 0x226   : > { %1167 = shalt.err (!%p1164_p3)
}
 0x227   : > { %s1168_s24 = scalar_lea.hbm %s1466_s17, 2048  ;;  %s1172_s10 = scalar_lea.hbm %s1518_s5, 4096 }
 0x228   : > { %p1169_p11 = scmp.ne.s32.totalorder %s1466_s17, %s1168_s24  ;;  %p1173_p4 = scmp.lt.s32.totalorder %s1466_s17, %s1518_s5 }
 0x229   : > { %p1174_p6 = scmp.lt.s32.totalorder %s1172_s10, %s1168_s24 }
 0x22a   : > { %p1170_p9 = pnand %p1169_p11, %p1535_p2 }
 0x22b   : > { %p1175_p8 = por %p1174_p6, %p1173_p4 }
 0x22c   : > { %p1171_p1 = pneg %p1170_p9 }
 0x22e   : > { %p1176_p5 = pnand %p1175_p8, %p1171_p1 }
 0x230   : > { %1179 = shalt.err (!%p1176_p5)
}
 0x231   : > { %s1230_s14 = smov 128   ;;  %s1231_s28 = smov 8  }
 0x232   : > { %989 = dma.vmem_to_hbm [thread:$0]  (%p1535_p2), %s1468_s7, 2048, %s1466_s17, %s732_s22, %s1230_s14, %s1230_s14, %s1231_s28  }
 0x233 PF: > { %s760_s11 = sand.u32 1, %s1210_s18   ;;  %p1536_p7 = scmp.ne.s32.totalorder %s1525_s25, 0 }
 0x234   : > { %p1537_p12 = scmp.ge.s32.totalorder %s1222_s21, 2  ;;  %s761_s16 = scalar_lea.sflag [#allocation4], %s760_s11 }
 0x236   : > { %p1003_p13 = pnand %p1537_p12, %p1536_p7 }
 0x238   : > { %p1004_p0 = pneg %p1003_p13 }
 0x23a   : > { %1205 = dma.done.wait (%p1004_p0), %s761_s16, 2048  }
 0x23b   : > { %1207 = vsyncadd (%p1004_p0), %s761_s16, 4294965248  ;;  %p19_p10 = scmp.ge.s32.totalorder %s1340_s15, 4   ;;  %s1538_s18 = smov %s1214_s19 }
 0x23c   : > { %s1539_s19 = smov %s1218_s20  ;;  %s1540_s20 = smov %s1356_s27 }
 0x23d   : > { %s1541_s21 = smov %s1340_s15  ;;  %21 = sbr.rel (!%p19_p10) target bundleno = 6 (0x6), region = 93 }
 0x242   :  { %766 = vsyncpa [#allocation3], 1 }
 0x243   :  { %768 = vsyncpa [#allocation3 + $0x1], 1 }
 0x244   :  { %769 = vsyncpa [#allocation6], 1 }
 0x245   :  { %770 = vsyncpa [#allocation4], 1 }
 0x246   :  { %772 = vsyncpa [#allocation4 + $0x1], 1 }

</bundles_post_ra>
